<compile_context>
chip_gen: v5e
topology: v5e:2x2
jax: 0.10.0
libtpu: 0.0.40
codegen_flags: <defaults>
</compile_context>

<pallas_src>
import functools

import jax
import jax.numpy as jnp
from jax.experimental import pallas as pl
from jax.experimental.pallas import tpu as pltpu


def _round_up(x, m):
    return (x + m - 1) // m * m


def _mfm_conv_kernel(x_ref, w_ref, b_ref, out_ref, slab_ref, *, H, W, K):
    """Fused k x k 'same' conv + MFM max for one batch tile.

    x_ref   : (Nb, Cin_p, H*W)            channel-major, spatial flattened (bf16)
    w_ref   : (2*Cout_p, K*K*Cin_p)       both MFM halves stacked; column order
                                          (dy, dx, cin) (bf16)
    b_ref   : (2*Cout_p, 1)               bias, both halves stacked (f32)
    out_ref : (Nb, Cout, H*W)
    slab_ref: (K*K*Cin_p, Nb*H*W)         VMEM scratch im2col slab (bf16)
    """
    nb, cin_p, HW = x_ref.shape
    cout_p = w_ref.shape[0] // 2
    cout = out_ref.shape[1]
    R = K // 2
    pad = _round_up(max(R * W + R, 1), 128)       # lane-aligned zero extension

    # Horizontal-edge masks emulating 'same' zero padding: only 2R distinct
    # masks exist (dx = 0 needs none); build them once, reuse across dy/images.
    col = jax.lax.broadcasted_iota(jnp.int32, (cin_p, HW), 1) % W
    masks = {}
    for dx in range(-R, R + 1):
        if dx < 0:
            masks[dx] = (col >= -dx).astype(x_ref.dtype)
        elif dx > 0:
            masks[dx] = (col < W - dx).astype(x_ref.dtype)

    # Build the im2col slab directly in VMEM scratch: rows grouped by
    # (dy, dx) tap, columns grouped by image (HW is the fast/lane axis).
    for b in range(nb):
        x = x_ref[b]                                          # (Cin_p, HW)
        zeros = jnp.zeros((cin_p, pad), dtype=x.dtype)
        # Zero extension covers vertical over/underflow of the taps.
        xpad = jnp.concatenate([zeros, x, zeros], axis=1)     # (Cin_p, HW+2*pad)
        t = 0
        for dy in range(-R, R + 1):
            for dx in range(-R, R + 1):
                s = dy * W + dx
                tap = xpad[:, pad + s: pad + s + HW]          # (Cin_p, HW)
                if dx != 0:                                    # mask row wrap
                    tap = tap * masks[dx]
                slab_ref[pl.ds(t * cin_p, cin_p), pl.ds(b * HW, HW)] = tap
                t += 1

    # One fused matmul for both MFM halves over the whole batch tile.
    acc = jnp.dot(w_ref[...], slab_ref[...],
                  preferred_element_type=jnp.float32)          # (2*Cout_p, Nb*HW)
    acc = acc + b_ref[...]
    # Sublane-aligned split (Cout_p % 8 == 0) -> pure VPU max, no XLU shuffle.
    m = jnp.maximum(acc[:cout_p], acc[cout_p:])                # (Cout_p, Nb*HW)
    for b in range(nb):
        out_ref[b] = m[:cout, b * HW:(b + 1) * HW].astype(out_ref.dtype)


def mfm_forward(x_nchw, weight, bias, *, compute_dtype=jnp.bfloat16):
    """mfm forward (type=1).  x: (N, Cin, H, W), weight: (2*Cout, Cin, K, K)."""
    N, Cin, H, W = x_nchw.shape
    two_cout, w_cin, kh, kw = weight.shape
    assert w_cin == Cin and kh == kw and kh % 2 == 1, "square odd kernel expected"
    K = kh
    Cout = two_cout // 2
    HW = H * W
    R = K // 2

    # Pad channels to sublane multiples: zero channels / zero weight rows
    # contribute nothing; the MFM split then stays sublane-tile aligned.
    cin_p = _round_up(Cin, 8)
    cout_p = _round_up(Cout, 8)
    kkc = K * K * cin_p

    x_flat = x_nchw.reshape(N, Cin, HW).astype(compute_dtype)  # free reshape
    if cin_p != Cin:
        x_flat = jnp.pad(x_flat, ((0, 0), (0, cin_p - Cin), (0, 0)))

    w_p = weight
    if cin_p != Cin:
        w_p = jnp.pad(weight, ((0, 0), (0, cin_p - Cin), (0, 0), (0, 0)))
    # (2*Cout, cin_p, K, K) -> (2*Cout, K*K*cin_p) with column order (dy, dx, cin),
    # then stack the two MFM halves into one fused MXU operand (rows padded to
    # cout_p so the in-kernel split is sublane aligned).
    w_cols = jnp.transpose(w_p, (0, 2, 3, 1)).reshape(2 * Cout, kkc)
    zrow = jnp.zeros((cout_p - Cout, kkc), w_cols.dtype)
    w_fused = jnp.concatenate([w_cols[:Cout], zrow, w_cols[Cout:], zrow],
                              axis=0).astype(compute_dtype)     # (2*cout_p, kkc)
    zb = jnp.zeros((cout_p - Cout,), bias.dtype)
    b_fused = jnp.concatenate([bias[:Cout], zb, bias[Cout:], zb]).reshape(
        2 * cout_p, 1).astype(jnp.float32)

    # --- VMEM budget & batch-tile selection -------------------------------
    pad = _round_up(max(R * W + R, 1), 128)
    cmp_b = jnp.dtype(compute_dtype).itemsize
    out_b = jnp.dtype(x_nchw.dtype).itemsize

    def footprint(nb):
        x_blk = 2 * nb * cin_p * HW * cmp_b            # double-buffered input
        o_blk = 2 * nb * Cout * HW * out_b              # double-buffered output
        w_blk = 2 * (2 * cout_p) * kkc * cmp_b          # weights (+buffer)
        slab = kkc * nb * HW * cmp_b                    # im2col scratch slab
        xpad_b = cin_p * (HW + 2 * pad) * cmp_b         # per-image extension
        acc = 2 * (2 * cout_p) * nb * HW * 4            # f32 acc + max temp
        return x_blk + o_blk + w_blk + slab + xpad_b + acc

    budget = 24 << 20          # conservative: fits v7x (64 MiB VMEM) comfortably
    cands = [nb for nb in range(1, min(N, 8) + 1)
             if N % nb == 0 and footprint(nb) <= budget] or [1]
    # Prefer the largest tile that still leaves >= 2 grid steps (v7x has two
    # TensorCores); otherwise just take the largest tile that fits.
    multi = [nb for nb in cands if N // nb >= 2]
    Nb = max(multi) if multi else max(cands)
    grid = (N // Nb,)
    vmem_limit = min(64 << 20, max(32 << 20, int(footprint(Nb) * 3 // 2)))

    kernel = functools.partial(_mfm_conv_kernel, H=H, W=W, K=K)

    out_flat = pl.pallas_call(
        kernel,
        out_shape=jax.ShapeDtypeStruct((N, Cout, HW), x_nchw.dtype),
        grid_spec=pltpu.PrefetchScalarGridSpec(
            num_scalar_prefetch=0,
            grid=grid,
            in_specs=[
                pl.BlockSpec((Nb, cin_p, HW), lambda n: (n, 0, 0)),
                pl.BlockSpec((2 * cout_p, kkc), lambda n: (0, 0)),
                pl.BlockSpec((2 * cout_p, 1), lambda n: (0, 0)),
            ],
            out_specs=pl.BlockSpec((Nb, Cout, HW), lambda n: (n, 0, 0)),
            scratch_shapes=[pltpu.VMEM((kkc, Nb * HW), compute_dtype)],
        ),
        compiler_params=pltpu.CompilerParams(
            dimension_semantics=("parallel",),
            vmem_limit_bytes=vmem_limit),
    )(x_flat, w_fused, b_fused)

    return out_flat.reshape(N, Cout, H, W)            # free reshape


def _reference_forward(x_nchw, weight, bias):
    """Pure-JAX reference (NCHW conv + MFM max), full f32 precision."""
    cout = weight.shape[0] // 2
    p = weight.shape[2] // 2
    y = jax.lax.conv_general_dilated(
        x_nchw, weight, window_strides=(1, 1),
        padding=((p, p), (p, p)),
        dimension_numbers=("NCHW", "OIHW", "NCHW"),
        precision=jax.lax.Precision.HIGHEST)
    y = y + bias[None, :, None, None]
    return jnp.maximum(y[:, :cout], y[:, cout:])


if __name__ == "__main__":
    key = jax.random.PRNGKey(0)
    kx, kw_, kb = jax.random.split(key, 3)

    N, Cin, Cout, H, W, K = 2, 4, 8, 16, 16, 3
    x = jax.random.normal(kx, (N, Cin, H, W), dtype=jnp.float32)
    fan_in = Cin * K * K
    bound = 1.0 / float(fan_in) ** 0.5
    weight = jax.random.uniform(kw_, (2 * Cout, Cin, K, K), jnp.float32,
                                -bound, bound)
    bias = jax.random.uniform(kb, (2 * Cout,), jnp.float32, -bound, bound)

    out = jax.block_until_ready(mfm_forward(x, weight, bias))
    assert out.shape == (N, Cout, H, W)

    # The kernel uses bf16 matmul operands (f32 accumulation).  Compare against
    # a full-precision reference fed the SAME bf16-rounded operands so only
    # accumulation-order noise remains.
    xq = x.astype(jnp.bfloat16).astype(jnp.float32)
    wq = weight.astype(jnp.bfloat16).astype(jnp.float32)
    ref = _reference_forward(xq, wq, bias)
    assert jnp.allclose(out, ref, rtol=2e-3, atol=2e-3), "mismatch vs reference"
    print("KERNEL_OK")
</pallas_src>

<mosaic_0001>
module attributes {stable_mosaic.version = 11 : i64} {
  func.func @_mfm_conv_kernel(%arg0: i32, %arg1: memref<1x8x256xbf16, #tpu.memory_space<vmem>>, %arg2: memref<16x72xbf16, #tpu.memory_space<vmem>>, %arg3: memref<16x1xf32, #tpu.memory_space<vmem>>, %arg4: memref<1x8x256xf32, #tpu.memory_space<vmem>>, %arg5: memref<72x256xbf16, #tpu.memory_space<vmem>>) attributes {dimension_semantics = [#tpu.dimension_semantics<parallel>], iteration_bounds = array<i64: 2>, scalar_prefetch = 0 : i64, scratch_operands = 1 : i64, tpu.core_type = #tpu.core_type<tc>, window_params = [{transform_indices = @transform_0, window_bounds = array<i64: 1, 8, 256>}, {pipeline_mode = #tpu.pipeline_mode<synchronous>, transform_indices = @transform_1, window_bounds = array<i64: 16, 72>}, {pipeline_mode = #tpu.pipeline_mode<synchronous>, transform_indices = @transform_2, window_bounds = array<i64: 16, 1>}, {transform_indices = @transform_3, window_bounds = array<i64: 1, 8, 256>}]} {
    %0 = tpu.iota {dimensions = array<i32: 1>} : vector<8x256xi32>
    %c16_i32 = arith.constant 16 : i32
    %c0_i32 = arith.constant 0 : i32
    %1 = arith.cmpi eq, %c16_i32, %c0_i32 : i32
    %c1_i32 = arith.constant 1 : i32
    %2 = arith.select %1, %c1_i32, %c16_i32 : i32
    %3 = vector.broadcast %2 : i32 to vector<8x256xi32>
    %4 = arith.remsi %0, %3 : vector<8x256xi32>
    %c0_i32_0 = arith.constant 0 : i32
    %5 = vector.broadcast %c0_i32_0 : i32 to vector<8x256xi32>
    %6 = arith.cmpi ne, %4, %5 : vector<8x256xi32>
    %c0_i32_1 = arith.constant 0 : i32
    %7 = vector.broadcast %c0_i32_1 : i32 to vector<8x256xi32>
    %8 = arith.cmpi slt, %4, %7 : vector<8x256xi32>
    %c0_i32_2 = arith.constant 0 : i32
    %9 = arith.cmpi slt, %2, %c0_i32_2 : i32
    %10 = vector.broadcast %9 : i1 to vector<8x256xi1>
    %11 = vector.broadcast %10 : vector<8x256xi1> to vector<8x256xi1>
    %12 = arith.xori %8, %11 : vector<8x256xi1>
    %13 = arith.andi %12, %6 : vector<8x256xi1>
    %14 = vector.broadcast %2 : i32 to vector<8x256xi32>
    %15 = arith.addi %4, %14 : vector<8x256xi32>
    %16 = arith.select %13, %15, %4 : vector<8x256xi1>, vector<8x256xi32>
    %c1_i32_3 = arith.constant 1 : i32
    %17 = vector.broadcast %c1_i32_3 : i32 to vector<8x256xi32>
    %18 = arith.cmpi sge, %16, %17 : vector<8x256xi32>
    %19 = arith.extui %18 : vector<8x256xi1> to vector<8x256xi32>
    %20 = arith.sitofp %19 : vector<8x256xi32> to vector<8x256xf32>
    %21 = arith.truncf %20 : vector<8x256xf32> to vector<8x256xbf16>
    %c15_i32 = arith.constant 15 : i32
    %22 = vector.broadcast %c15_i32 : i32 to vector<8x256xi32>
    %23 = arith.cmpi slt, %16, %22 : vector<8x256xi32>
    %24 = arith.extui %23 : vector<8x256xi1> to vector<8x256xi32>
    %25 = arith.sitofp %24 : vector<8x256xi32> to vector<8x256xf32>
    %26 = arith.truncf %25 : vector<8x256xf32> to vector<8x256xbf16>
    %c0 = arith.constant 0 : index
    %c0_4 = arith.constant 0 : index
    %c0_5 = arith.constant 0 : index
    %27 = vector.load %arg1[%c0, %c0_4, %c0_5] : memref<1x8x256xbf16, #tpu.memory_space<vmem>>, vector<1x8x256xbf16>
    %28 = vector.shape_cast %27 : vector<1x8x256xbf16> to vector<8x256xbf16>
    %cst = arith.constant 0.000000e+00 : bf16
    %29 = vector.broadcast %cst : bf16 to vector<8x128xbf16>
    %30 = tpu.concatenate %29, %28, %29 in 1 : vector<8x128xbf16>, vector<8x256xbf16>, vector<8x128xbf16> -> vector<8x512xbf16>
    %31 = vector.extract_strided_slice %30 {offsets = [0, 111], sizes = [8, 256], strides = [1, 1]} : vector<8x512xbf16> to vector<8x256xbf16>
    %32 = arith.mulf %31, %21 : vector<8x256xbf16>
    %c0_6 = arith.constant 0 : index
    %c0_7 = arith.constant 0 : index
    %33 = vector.load %arg5[%c0_6, %c0_7] : memref<72x256xbf16, #tpu.memory_space<vmem>>, vector<8x256xbf16>
    tpu.vector_store %arg5[%c0_6, %c0_7], %32 {strides = array<i32>} : memref<72x256xbf16, #tpu.memory_space<vmem>>, vector<8x256xbf16>,
    %34 = vector.extract_strided_slice %30 {offsets = [0, 112], sizes = [8, 256], strides = [1, 1]} : vector<8x512xbf16> to vector<8x256xbf16>
    %c8 = arith.constant 8 : index
    %c0_8 = arith.constant 0 : index
    %35 = vector.load %arg5[%c8, %c0_8] : memref<72x256xbf16, #tpu.memory_space<vmem>>, vector<8x256xbf16>
    tpu.vector_store %arg5[%c8, %c0_8], %34 {strides = array<i32>} : memref<72x256xbf16, #tpu.memory_space<vmem>>, vector<8x256xbf16>,
    %36 = vector.extract_strided_slice %30 {offsets = [0, 113], sizes = [8, 256], strides = [1, 1]} : vector<8x512xbf16> to vector<8x256xbf16>
    %37 = arith.mulf %36, %26 : vector<8x256xbf16>
    %c16 = arith.constant 16 : index
    %c0_9 = arith.constant 0 : index
    %38 = vector.load %arg5[%c16, %c0_9] : memref<72x256xbf16, #tpu.memory_space<vmem>>, vector<8x256xbf16>
    tpu.vector_store %arg5[%c16, %c0_9], %37 {strides = array<i32>} : memref<72x256xbf16, #tpu.memory_space<vmem>>, vector<8x256xbf16>,
    %39 = vector.extract_strided_slice %30 {offsets = [0, 127], sizes = [8, 256], strides = [1, 1]} : vector<8x512xbf16> to vector<8x256xbf16>
    %40 = arith.mulf %39, %21 : vector<8x256xbf16>
    %c24 = arith.constant 24 : index
    %c0_10 = arith.constant 0 : index
    %41 = vector.load %arg5[%c24, %c0_10] : memref<72x256xbf16, #tpu.memory_space<vmem>>, vector<8x256xbf16>
    tpu.vector_store %arg5[%c24, %c0_10], %40 {strides = array<i32>} : memref<72x256xbf16, #tpu.memory_space<vmem>>, vector<8x256xbf16>,
    %42 = vector.extract_strided_slice %30 {offsets = [0, 128], sizes = [8, 256], strides = [1, 1]} : vector<8x512xbf16> to vector<8x256xbf16>
    %c32 = arith.constant 32 : index
    %c0_11 = arith.constant 0 : index
    %43 = vector.load %arg5[%c32, %c0_11] : memref<72x256xbf16, #tpu.memory_space<vmem>>, vector<8x256xbf16>
    tpu.vector_store %arg5[%c32, %c0_11], %42 {strides = array<i32>} : memref<72x256xbf16, #tpu.memory_space<vmem>>, vector<8x256xbf16>,
    %44 = vector.extract_strided_slice %30 {offsets = [0, 129], sizes = [8, 256], strides = [1, 1]} : vector<8x512xbf16> to vector<8x256xbf16>
    %45 = arith.mulf %44, %26 : vector<8x256xbf16>
    %c40 = arith.constant 40 : index
    %c0_12 = arith.constant 0 : index
    %46 = vector.load %arg5[%c40, %c0_12] : memref<72x256xbf16, #tpu.memory_space<vmem>>, vector<8x256xbf16>
    tpu.vector_store %arg5[%c40, %c0_12], %45 {strides = array<i32>} : memref<72x256xbf16, #tpu.memory_space<vmem>>, vector<8x256xbf16>,
    %47 = vector.extract_strided_slice %30 {offsets = [0, 143], sizes = [8, 256], strides = [1, 1]} : vector<8x512xbf16> to vector<8x256xbf16>
    %48 = arith.mulf %47, %21 : vector<8x256xbf16>
    %c48 = arith.constant 48 : index
    %c0_13 = arith.constant 0 : index
    %49 = vector.load %arg5[%c48, %c0_13] : memref<72x256xbf16, #tpu.memory_space<vmem>>, vector<8x256xbf16>
    tpu.vector_store %arg5[%c48, %c0_13], %48 {strides = array<i32>} : memref<72x256xbf16, #tpu.memory_space<vmem>>, vector<8x256xbf16>,
    %50 = vector.extract_strided_slice %30 {offsets = [0, 144], sizes = [8, 256], strides = [1, 1]} : vector<8x512xbf16> to vector<8x256xbf16>
    %c56 = arith.constant 56 : index
    %c0_14 = arith.constant 0 : index
    %51 = vector.load %arg5[%c56, %c0_14] : memref<72x256xbf16, #tpu.memory_space<vmem>>, vector<8x256xbf16>
    tpu.vector_store %arg5[%c56, %c0_14], %50 {strides = array<i32>} : memref<72x256xbf16, #tpu.memory_space<vmem>>, vector<8x256xbf16>,
    %52 = vector.extract_strided_slice %30 {offsets = [0, 145], sizes = [8, 256], strides = [1, 1]} : vector<8x512xbf16> to vector<8x256xbf16>
    %53 = arith.mulf %52, %26 : vector<8x256xbf16>
    %c64 = arith.constant 64 : index
    %c0_15 = arith.constant 0 : index
    %54 = vector.load %arg5[%c64, %c0_15] : memref<72x256xbf16, #tpu.memory_space<vmem>>, vector<8x256xbf16>
    tpu.vector_store %arg5[%c64, %c0_15], %53 {strides = array<i32>} : memref<72x256xbf16, #tpu.memory_space<vmem>>, vector<8x256xbf16>,
    %c0_16 = arith.constant 0 : index
    %c0_17 = arith.constant 0 : index
    %55 = vector.load %arg2[%c0_16, %c0_17] : memref<16x72xbf16, #tpu.memory_space<vmem>>, vector<16x72xbf16>
    %c0_18 = arith.constant 0 : index
    %c0_19 = arith.constant 0 : index
    %56 = vector.load %arg5[%c0_18, %c0_19] : memref<72x256xbf16, #tpu.memory_space<vmem>>, vector<72x256xbf16>
    %cst_20 = arith.constant dense<0.000000e+00> : vector<16x256xf32>
    %57 = tpu.matmul %55, %56, %cst_20 {dimension_numbers = #tpu.dot_dimension_numbers<[1], [0], [0], [1], [0, 0, 1, 1], [], []>} : vector<16x72xbf16>, vector<72x256xbf16>, vector<16x256xf32> -> vector<16x256xf32>
    %c0_21 = arith.constant 0 : index
    %c0_22 = arith.constant 0 : index
    %58 = vector.load %arg3[%c0_21, %c0_22] : memref<16x1xf32, #tpu.memory_space<vmem>>, vector<16x1xf32>
    %59 = vector.broadcast %58 : vector<16x1xf32> to vector<16x256xf32>
    %60 = arith.addf %57, %59 : vector<16x256xf32>
    %61 = vector.extract_strided_slice %60 {offsets = [0, 0], sizes = [8, 256], strides = [1, 1]} : vector<16x256xf32> to vector<8x256xf32>
    %62 = vector.extract_strided_slice %60 {offsets = [8, 0], sizes = [8, 256], strides = [1, 1]} : vector<16x256xf32> to vector<8x256xf32>
    %63 = arith.maximumf %61, %62 : vector<8x256xf32>
    %c0_23 = arith.constant 0 : index
    %c0_24 = arith.constant 0 : index
    %c0_25 = arith.constant 0 : index
    %64 = vector.load %arg4[%c0_23, %c0_24, %c0_25] : memref<1x8x256xf32, #tpu.memory_space<vmem>>, vector<1x8x256xf32>
    %65 = vector.shape_cast %64 : vector<1x8x256xf32> to vector<8x256xf32>
    %66 = vector.shape_cast %63 : vector<8x256xf32> to vector<1x8x256xf32>
    tpu.vector_store %arg4[%c0_23, %c0_24, %c0_25], %66 {strides = array<i32>} : memref<1x8x256xf32, #tpu.memory_space<vmem>>, vector<1x8x256xf32>,
    return
  }
  func.func @transform_0(%arg0: i32) -> (i32, i32, i32) {
    %c0_i32 = arith.constant 0 : i32
    %c0_i32_0 = arith.constant 0 : i32
    %c0_i32_1 = arith.constant 0 : i32
    return %arg0, %c0_i32, %c0_i32_0 : i32, i32, i32
  }
  func.func @transform_1(%arg0: i32) -> (i32, i32) {
    %c0_i32 = arith.constant 0 : i32
    %c0_i32_0 = arith.constant 0 : i32
    %c0_i32_1 = arith.constant 0 : i32
    return %c0_i32, %c0_i32_0 : i32, i32
  }
  func.func @transform_2(%arg0: i32) -> (i32, i32) {
    %c0_i32 = arith.constant 0 : i32
    %c0_i32_0 = arith.constant 0 : i32
    %c0_i32_1 = arith.constant 0 : i32
    return %c0_i32, %c0_i32_0 : i32, i32
  }
  func.func @transform_3(%arg0: i32) -> (i32, i32, i32) {
    %c0_i32 = arith.constant 0 : i32
    %c0_i32_0 = arith.constant 0 : i32
    %c0_i32_1 = arith.constant 0 : i32
    return %arg0, %c0_i32, %c0_i32_0 : i32, i32, i32
  }
}

</mosaic_0001>

<bundles_post_ra>
// kernel: tpu_custom_call.1
= control target key start
LH: loop header
LB: loop body
LE: loop exit
PB: predicated region body
PF: predicated region fallthrough
CT: control target
= control target key end

     0   :  { %8 = vsyncpa [#allocation4], 0  ;;  %s1102_s0 = inlined_call_operand.vmem [shape: bf16[2,8,256], index: 0, kind: input, shape index: {}]   ;;  %s1103_s1 = inlined_call_operand.hbm [shape: bf16[16,72], index: 1, kind: input, shape index: {}]   ;;  %s1104_s2 = inlined_call_operand.vmem [shape: f32[16,1], index: 2, kind: input, shape index: {}]   ;;  %s1105_s3 = inlined_call_operand.hbm [shape: f32[2,8,256], index: 3, kind: output, shape index: {}]  }
   0x1   :  { %9 = vsyncpa [#allocation5], 0 }
   0x2   :  { %11 = vsyncpa [#allocation5 + $0x1], 0  ;;  %s936_s12 = smov 0   ;;  %s938_s13 = smov 0  }
   0x3   :  { %s940_s14 = smov 0   ;;  %s942_s15 = smov 0  }
   0x4 LB: > { %s957_s16 = sadd.s32 4294967295, %s901_s15   ;;  %s643_s17 = sadd.s32 4294967294, %s901_s15   ;;  %s901_s15 = sphi %s942_s15, %s1111_s15   ;;  %s897_s14 = sphi %s940_s14, %s1110_s14   ;;  %s893_s13 = sphi %s938_s13, %s1109_s13   ;;  %s889_s12 = sphi %s936_s12, %s1108_s12  }
   0x5   : > { %s961_s18 = sadd.s32 1, %s901_s15   ;;  %s92_s19 = sadd.s32 1, %s897_s14 }
   0x6   : > { %s89_s20 = ssub.s32 %s901_s15, %s961_s18  ;;  %p102_p0 = scmp.ne.s32.totalorder %s897_s14, %s893_s13 }
   0x7   : > { %p90_p1 = scmp.eq.s32.totalorder %s89_s20, 0  ;;  %p103_p2 = scmp.eq.s32.totalorder %s957_s16, 1 }
   0x8   : > { %p108_p3 = scmp.ne.s32.totalorder %s893_s13, %s889_s12  ;;  %p109_p4 = scmp.eq.s32.totalorder %s643_s17, 1 }
   0x9   : > { %s972_s21 = scalar_select %p90_p1, %s897_s14, %s92_s19  }
   0xa   : > { %p974_p5 = por %p103_p2, %p102_p0  ;;  %p978_p6 = por %p109_p4, %p108_p3 }
   0xb   : > { %p644_p7 = scmp.ge.s32.totalorder %s901_s15, 1  ;;  %p116_p8 = scmp.lt.s32.totalorder %s901_s15, 3 }
   0xc   : > { %p724_p9 = scmp.eq.s32.totalorder %s957_s16, 0  ;;  %s127_s26 = sshll.u32 %s1103_s1, 4  ;;  %s128_s26 = int_to_ptr.hbm [resolvable:$true] %s127_s26 }
   0xd   : > { %p117_p10 = pnand %p644_p7, %p116_p8  ;;  %s903_s27 = smov [#allocation3]  }
   0xe   : > { %s129_s28 = sshll.u32 %s903_s27, 4  ;;  %s904_s29 = smov 64   ;;  %s130_s28 = int_to_ptr.vmem [resolvable:$true] %s129_s28 }
   0xf   : > { %p716_p11 = pneg %p117_p10  ;;  %s905_s30 = smov 4  }
  0x10   : > { %156 = sbr.rel (%p117_p10) target bundleno = 476 (0x1dc), region = 32 }
  0x11   : > { %p717_p12 = pnand %p724_p9, %p716_p11 }
  0x13   : > { %719 = dma.hbm_to_vmem [thread:$0]  (!%p717_p12), %s128_s26, 128, %s130_s28, [#allocation4], %s904_s29, %s904_s29, %s905_s30  }
  0x15   : > { %v187_v0 = vlaneseq }
  0x16   : > { %880 = dma.done.wait (%p724_p9), [#allocation4], 128  }
  0x17   : > { %882 = vsyncadd (%p724_p9), [#allocation4], 4294967168  ;;  %v906_v1 = vmov 0   ;;  %v188_v2 = vand.u32 127, %v187_v0  ;;  %p181_p13 = scmp.lt.s32.totalorder %s957_s16, 1  ;;  %v907_v6 = vmov 0.0  }
  0x18   : > { %802 = vset.pattern.permute.xlu1 %v906_v1  ;;  %803 = vset.pattern.permute.xlu2 %v906_v1  ;;  %s908_s9 = smov 17   ;;  %s909_s10 = smov 1   ;;  %v1005_v14 = vunpack.c.l.b16 %v906_v1  ;;  %v1016_v23 = vunpack.c.l.bf16 %v906_v1  ;;  %vm320_vm4 = vcmask 1039360   ;;  %vm312_vm5 = vcmask 121856  }
  0x19   : > { %804 = vset.pattern.permute.xlu0 %v906_v1  ;;  %v189_v3 = vadd.s32 128, %v188_v2  ;;  %v194_v4 = vand.u32 15, %v188_v2  ;;  %s182_s4 = scalar_select %p181_p13, %s957_s16, 1  ;;  %vm293_vm6 = vcmask 924672   ;;  %vm267_vm7 = vcmask 138240  }
  0x1a   : > { %s910_s11 = smov 127   ;;  %s911_s17 = smov 15   ;;  %v400_v15 = vpack.c.b16 %v1005_v14, %v1005_v14  ;;  %vm339_vm8 = vcmask 7168   ;;  %vm247_vm9 = vcmask 908288   ;;  %vm265_vm10 = vcmask 1043456  }
  0x1b   : > { %v201_v5 = vand.u32 15, %v189_v3  ;;  %vm221_vm0 = vcmp.lt.s32.totalorder %v194_v4, 15  ;;  %vm214_vm1 = vcmp.ge.s32.totalorder %v194_v4, 1  ;;  %s699_s5 = sshll.u32 %s182_s4, 3  ;;  %s912_s19 = smov 113   ;;  %vm408_vm11 = vcmask 916480  }
  0x1c   : > { %v654_v7 = vsel %vm221_vm0, 1.0, %v907_v6  ;;  %s185_s8 = scalar_lea.vmem %s1102_s0, %s699_s5  ;;  %v652_v11 = vsel %vm214_vm1, 1.0, %v907_v6  ;;  %s913_s20 = smov 111   ;;  %vm281_vm12 = vcmask 130048   ;;  %vm512_vm13 = vcmask 588800  }
  0x1d   : > { %vm222_vm2 = vcmp.lt.s32.totalorder %v201_v5, 15  ;;  %vm215_vm3 = vcmp.ge.s32.totalorder %v201_v5, 1  ;;  %v228_v9 = vld [vmem:[%s185_s8] sm:$0xff]  ;;  %s914_s24 = smov 112   ;;  %s915_s25 = smov 16  }
  0x1e   : > { %v655_v8 = vsel %vm222_vm2, 1.0, %v907_v6  ;;  %v653_v12 = vsel %vm215_vm3, 1.0, %v907_v6  ;;  %345 = vst [vmem:[#allocation2 + $0x20] sm:$0xff] %v228_v9  ;;  %v231_v16 = vunpack.c.h.b16 %v228_v9  ;;  %v230_v24 = vunpack.c.l.b16 %v228_v9  ;;  %s178_s30 = sand.u32 1, %s893_s13   ;;  %s709_s5 = sshll.u32 %s957_s16, 4 }
  0x1f   : > { %v772_v10 = vpack.i.bf16 %v655_v8, %v654_v7  ;;  %v792_v13 = vpack.i.bf16 %v653_v12, %v652_v11  ;;  %s649_s4 = sshll.u32 %s178_s30, 4  ;;  %s567_s8 = scalar_lea.hbm %s1105_s3, %s709_s5 }
  0x20   : > { %v1009_v17 = vpack.c.b16 %v231_v16, %v231_v16  ;;  %v232_v30 = vpack.c.b16 %v230_v24, %v230_v24  ;;  %v273_v63 = vpack.c.b16 %v230_v24, %v1005_v14  ;;  %s556_s16 = scalar_lea.sflag [#allocation5], %s178_s30 }
  0x21   : > { %773 = vrot.lane.b32.xlu0 %v772_v10, %s908_s9  ;;  %783 = vrot.lane.b32.xlu1 %v772_v10, %s909_s10 }
  0x22   : > { %793 = vrot.lane.b32.xlu2 %v792_v13, %s910_s11  ;;  %v1012_v18 = vunpack.c.l.bf16 %v1009_v17  ;;  %v237_v33 = vunpack.c.l.bf16 %v232_v30 }
  0x29   : > { %778 = vrot.lane.b32.xlu0 %v792_v13, %s911_s17  ;;  %788 = vrot.lane.b32.xlu1 %v772_v10, %s912_s19 }
  0x2a   : > { %798 = vrot.lane.b32.xlu2 %v792_v13, %s913_s20 }
  0x31   : > { %401 = vrot.lane.b32.xlu1 %v228_v9, %s914_s24 }
  0x32   : > { %403 = vrot.lane.b32.xlu2 %v400_v15, %s914_s24 }
  0x7c   : > { %v794_v19 = vpop.permute.xlu2 %793 }
  0x7d   : > { %v796_v20 = vunpack.i.h.bf16 %v794_v19  ;;  %v795_v34 = vunpack.i.l.bf16 %v794_v19 }
  0x7f   : > { %v327_v21 = vmul.f32 %v796_v20, %v1012_v18  ;;  %v321_v45 = vsel %vm320_vm4, %v795_v34, %v796_v20  ;;  %v325_v50 = vmul.f32 %v795_v34, %v1016_v23 }
  0x80   : > { %v326_v52 = vmul.f32 %v321_v45, %v237_v33 }
  0x81   : > { %v329_v22 = vpack.c.bf16 %v327_v21, %v327_v21 }
  0x82   : > { %v328_v58 = vpack.c.bf16 %v326_v52, %v325_v50 }
  0x83   : > { %334 = vrot.lane.b32.xlu2 %v329_v22, %s909_s10 }
  0x84   : > { %v799_v55 = vpop.permute.xlu2 %798 }
  0x85   : > { %v801_v59 = vunpack.i.h.bf16 %v799_v55  ;;  %v800_v6 = vunpack.i.l.bf16 %v799_v55 }
  0x87   : > { %v254_v62 = vmul.f32 %v801_v59, %v1012_v18  ;;  %v248_v9 = vsel %vm247_vm9, %v800_v6, %v801_v59  ;;  %v252_v11 = vmul.f32 %v800_v6, %v1016_v23  ;;  %v451_v59 = vld [vmem:[%s1104_s2 + $0x8] sm:$0xff] }
  0x88   : > { %v253_v12 = vmul.f32 %v248_v9, %v237_v33 }
  0x89   : > { %v256_v3 = vpack.c.bf16 %v254_v62, %v254_v62 }
  0x8a   : > { %v255_v13 = vpack.c.bf16 %v253_v12, %v252_v11 }
  0x8c   : > { %v404_v14 = vpop.permute.xlu2 %403 }
  0x8d   : > { %v406_v15 = vrot.slane %v404_v14, 4 }
  0x93   : > { %v774_v25 = vpop.permute.xlu0 %773  ;;  %v784_v26 = vpop.permute.xlu1 %783 }
  0x94   : > { %v776_v27 = vunpack.i.h.bf16 %v774_v25  ;;  %v786_v29 = vunpack.i.h.bf16 %v784_v26  ;;  %v775_v56 = vunpack.i.l.bf16 %v774_v25  ;;  %v785_v2 = vunpack.i.l.bf16 %v784_v26 }
  0x96   : > { %v423_v28 = vmul.f32 %v776_v27, %v1016_v23  ;;  %v357_v32 = vmul.f32 %v786_v29, %v1016_v23  ;;  %v417_v61 = vsel %vm267_vm7, %v775_v56, %v776_v27  ;;  %v421_v0 = vmul.f32 %v775_v56, %v237_v33 }
  0x97   : > { %v422_v1 = vmul.f32 %v417_v61, %v1012_v18  ;;  %v351_v5 = vsel %vm339_vm8, %v785_v2, %v786_v29  ;;  %v355_v7 = vmul.f32 %v785_v2, %v237_v33 }
  0x98   : > { %v425_v31 = vpack.c.bf16 %v423_v28, %v423_v28  ;;  %v359_v44 = vpack.c.bf16 %v357_v32, %v357_v32  ;;  %v356_v8 = vmul.f32 %v351_v5, %v1012_v18  ;;  %v705_v5 = vld [vmem:[#allocation2 + $0x24] sm:$0xf] }
  0x99   : > { %v424_v4 = vpack.c.bf16 %v422_v1, %v421_v0 }
  0x9a   : > { %430 = vrot.lane.b32.xlu1 %v425_v31, %s913_s20  ;;  %v358_v10 = vpack.c.bf16 %v356_v8, %v355_v7 }
  0x9b   : > { %v779_v35 = vpop.permute.xlu0 %778  ;;  %v789_v36 = vpop.permute.xlu1 %788 }
  0x9c   : > { %v781_v37 = vunpack.i.h.bf16 %v779_v35  ;;  %v780_v38 = vunpack.i.l.bf16 %v779_v35  ;;  %v791_v39 = vunpack.i.h.bf16 %v789_v36  ;;  %v790_v40 = vunpack.i.l.bf16 %v789_v36 }
  0x9e   : > { %v384_v41 = vmul.f32 %v781_v37, %v1016_v23  ;;  %v378_v42 = vsel %vm312_vm5, %v780_v38, %v781_v37  ;;  %v382_v43 = vmul.f32 %v780_v38, %v237_v33  ;;  %v294_v47 = vsel %vm293_vm6, %v790_v40, %v791_v39 }
  0x9f   : > { %v383_v46 = vmul.f32 %v378_v42, %v1012_v18  ;;  %v300_v51 = vmul.f32 %v791_v39, %v1012_v18  ;;  %v298_v53 = vmul.f32 %v790_v40, %v1016_v23  ;;  %v299_v54 = vmul.f32 %v294_v47, %v237_v33 }
  0xa0   : > { %v386_v48 = vpack.c.bf16 %v384_v41, %v384_v41 }
  0xa1   : > { %v385_v49 = vpack.c.bf16 %v383_v46, %v382_v43  ;;  %v302_v57 = vpack.c.bf16 %v300_v51, %v300_v51  ;;  %v301_v60 = vpack.c.bf16 %v299_v54, %v298_v53 }
  0xa2   : > { %391 = vrot.lane.b32.xlu0 %v386_v48, %s912_s19  ;;  %364 = vrot.lane.b32.xlu1 %v359_v44, %s910_s11 }
  0xa3   : > { %389 = vrot.lane.b32.xlu2 %v385_v49, %s912_s19  ;;  %v402_v16 = vpop.permute.xlu1 %401 }
  0xa4   : > { %v405_v19 = vrot.slane %v402_v16, 4 }
  0xa6   : > { %v407_v18 = vsel %vm265_vm10, %v405_v19, %v406_v15 }
  0xa7   : > { %v409_v20 = vsel %vm408_vm11, %v402_v16, %v407_v18 }
  0xa8   : > { %411 = vst [vmem:[#allocation2 + $0x38] sm:$0xff] %v409_v20 }
  0xaa   : > { %307 = vrot.lane.b32.xlu0 %v302_v57, %s911_s17  ;;  %332 = vrot.lane.b32.xlu1 %v328_v58, %s909_s10  ;;  %v450_v58 = vld [vmem:[%s1104_s2] sm:$0xff] }
  0xab   : > { %305 = vrot.lane.b32.xlu2 %v301_v60, %s911_s17 }
  0xaf   : > { %v708_v51 = vld [vmem:[#allocation2 + $0x34] sm:$0xf0]  ;;  %v688_v52 = vld [vmem:[#allocation2 + $0x38] sm:$0xf0] }
  0xb2   : > { %428 = vrot.lane.b32.xlu0 %v424_v4, %s913_s20  ;;  %261 = vrot.lane.b32.xlu1 %v256_v3, %s908_s9  ;;  %v678_v4 = vld [vmem:[#allocation2 + $0x20] sm:$0xf] }
  0xb3   : > { %274 = vrot.lane.b32.xlu2 %v273_v63, %s915_s25 }
  0xba   : > { %362 = vrot.lane.b32.xlu0 %v358_v10, %s910_s11  ;;  %454 = vperm.xlu1 %802, %v450_v58   ;;  %s571_s11 = sshll.u32 %s567_s8, 4  ;;  %s572_s11 = int_to_ptr.hbm [resolvable:$true] %s571_s11 }
  0xbb   : > { %459 = vperm.xlu2 %803, %v451_v59   ;;  %s849_s17 = sshra.s32 %s572_s11, 4  ;;  %s850_s17 = int_to_ptr.hbm [resolvable:$true] %s849_s17 }
  0xbc   : > { %s851_s19 = scalar_lea.hbm %s850_s17, 16  ;;  %p856_p3 = scmp.lt.s32.totalorder %s850_s17, %s1105_s3 }
  0xbd   : > { %p852_p0 = scmp.ne.s32.totalorder %s850_s17, %s851_s19 }
  0xbf   : > { %p853_p1 = pnand %p852_p0, %p974_p5 }
  0xc1   : > { %p854_p2 = pneg %p853_p1 }
  0xc2   : > { %259 = vrot.lane.b32.xlu0 %v255_v13, %s908_s9  ;;  %s180_s9 = scalar_lea.vmem [#allocation6], %s649_s4 }
  0xc3   : > { %s569_s10 = sshll.u32 %s180_s9, 4  ;;  %s570_s10 = int_to_ptr.vmem [resolvable:$true] %s569_s10 }
  0xca   : > { %276 = vrot.lane.b32.xlu0 %v1009_v17, %s915_s25  ;;  %s855_s25 = scalar_lea.hbm %s1105_s3, 32 }
  0xcb   : > { %p857_p4 = scmp.lt.s32.totalorder %s855_s25, %s851_s19 }
  0xcd   : > { %p858_p7 = por %p857_p4, %p856_p3 }
  0xcf   : > { %p859_p8 = pnand %p858_p7, %p854_p2 }
  0xdd   : > { %v335_v21 = vpop.permute.xlu2 %334 }
  0xde   : > { %v337_v32 = vrot.slane %v335_v21, 4 }
  0xfd   : > { %v390_v23 = vpop.permute.xlu2 %389 }
  0xfe   : > { %v393_v26 = vrot.slane %v390_v23, 4 }
 0x105   : > { %v306_v29 = vpop.permute.xlu2 %305 }
 0x106   : > { %v309_v33 = vrot.slane %v306_v29, 4 }
 0x10c   : > { %v431_v22 = vpop.permute.xlu1 %430 }
 0x10d   : > { %v433_v41 = vrot.slane %v431_v22, 4  ;;  %v275_v8 = vpop.permute.xlu2 %274 }
 0x10e   : > { %v278_v19 = vrot.slane %v275_v8, 4 }
 0x114   : > { %v392_v24 = vpop.permute.xlu0 %391  ;;  %v365_v25 = vpop.permute.xlu1 %364 }
 0x115   : > { %v394_v27 = vrot.slane %v392_v24, 4  ;;  %v367_v53 = vrot.slane %v365_v25, 4 }
 0x117   : > { %v395_v28 = vsel %vm265_vm10, %v393_v26, %v394_v27 }
 0x118   : > { %v397_v17 = vsel %vm293_vm6, %v390_v23, %v395_v28 }
 0x119   : > { %399 = vst [vmem:[#allocation2 + $0x30] sm:$0xff] %v397_v17 }
 0x11c   : > { %v308_v30 = vpop.permute.xlu0 %307  ;;  %v333_v31 = vpop.permute.xlu1 %332 }
 0x11d   : > { %v310_v34 = vrot.slane %v308_v30, 4  ;;  %v336_v35 = vrot.slane %v333_v31, 4  ;;  %v700_v30 = vld [vmem:[#allocation3] sm:$0xff] }
 0x11f   : > { %v311_v36 = vsel %vm265_vm10, %v309_v33, %v310_v34  ;;  %v338_v37 = vsel %vm265_vm10, %v336_v35, %v337_v32  ;;  %v460_v34 = vpop.permute.xlu2 %459 }
 0x120   : > { %v313_v38 = vsel %vm312_vm5, %v306_v29, %v311_v36  ;;  %v340_v39 = vsel %vm339_vm8, %v333_v31, %v338_v37  ;;  %v686_v50 = vld [vmem:[#allocation2 + $0x30] sm:$0xf]  ;;  %v707_v57 = vld [vmem:[#allocation2 + $0x34] sm:$0xf] }
 0x121   : > { %315 = vst [vmem:[#allocation2 + $0x10] sm:$0xff] %v313_v38  ;;  %v687_v63 = vor.u32 %v708_v51, %v686_v50  ;;  %v691_v0 = vor.u32 %v707_v57, %v688_v52 }
 0x122   : > { %342 = vst [vmem:[#allocation2 + $0x18] sm:$0xff] %v340_v39 }
 0x124   : > { %v429_v40 = vpop.permute.xlu0 %428  ;;  %v262_v62 = vpop.permute.xlu1 %261 }
 0x125   : > { %v432_v42 = vrot.slane %v429_v40, 4  ;;  %v264_v1 = vrot.slane %v262_v62, 4 }
 0x127   : > { %v434_v43 = vsel %vm265_vm10, %v432_v42, %v433_v41 }
 0x128   : > { %v436_v44 = vsel %vm247_vm9, %v429_v40, %v434_v43  ;;  %v670_v13 = vld [vmem:[#allocation2 + $0x10] sm:$0xf]  ;;  %v703_v15 = vld [vmem:[#allocation2 + $0x14] sm:$0xf] }
 0x129   : > { %v492_v45 = vunpack.c.l.b16 %v436_v44  ;;  %v493_v46 = vunpack.c.h.b16 %v436_v44  ;;  %v704_v14 = vld [vmem:[#allocation2 + $0x14] sm:$0xf0]  ;;  %v672_v16 = vld [vmem:[#allocation2 + $0x18] sm:$0xf0] }
 0x12a   : > { %v671_v21 = vor.u32 %v704_v14, %v670_v13  ;;  %v675_v22 = vor.u32 %v703_v15, %v672_v16 }
 0x12b   : > { %v502_v47 = vpack.c.b16 %v492_v45, %v492_v45  ;;  %v503_v48 = vpack.c.b16 %v493_v46, %v493_v46 }
 0x12c   : > { %v363_v49 = vpop.permute.xlu0 %362  ;;  %v455_v33 = vpop.permute.xlu1 %454 }
 0x12d   : > { %v366_v54 = vrot.slane %v363_v49, 4  ;;  %v518_v55 = vsel %vm265_vm10, %v502_v47, 0  ;;  %v521_v56 = vsel %vm265_vm10, %v503_v48, 0 }
 0x12e   : > { %526 = vmatpush.bf16.msra.mxu0 %v518_v55  ;;  %540 = vmatpush.bf16.msra.mxu1 %v521_v56 }
 0x12f   : > { %v368_v60 = vsel %vm265_vm10, %v366_v54, %v367_v53 }
 0x130   : > { %v370_v61 = vsel %vm320_vm4, %v363_v49, %v368_v60 }
 0x131   : > { %372 = vst [vmem:[#allocation2 + $0x28] sm:$0xff] %v370_v61 }
 0x132   : > { %527 = vmatpush.bf16.msra.mxu0 %v687_v63  ;;  %541 = vmatpush.bf16.msra.mxu1 %v691_v0 }
 0x134   : > { %v260_v2 = vpop.permute.xlu0 %259 }
 0x135   : > { %v263_v3 = vrot.slane %v260_v2, 4 }
 0x137   : > { %v266_v6 = vsel %vm265_vm10, %v263_v3, %v264_v1 }
 0x138   : > { %v268_v7 = vsel %vm267_vm7, %v260_v2, %v266_v6  ;;  %v706_v9 = vld [vmem:[#allocation2 + $0x24] sm:$0xf0]  ;;  %v680_v10 = vld [vmem:[#allocation2 + $0x28] sm:$0xf0] }
 0x139   : > { %270 = vst [vmem:[#allocation2] sm:$0xff] %v268_v7  ;;  %v679_v11 = vor.u32 %v706_v9, %v678_v4  ;;  %v683_v12 = vor.u32 %v705_v5, %v680_v10 }
 0x13b   : > { %528 = vmatpush.bf16.msra.mxu0 %v679_v11  ;;  %542 = vmatpush.bf16.msra.mxu1 %v683_v12 }
 0x13c   : > { %v277_v18 = vpop.permute.xlu0 %276 }
 0x13d   : > { %v279_v20 = vrot.slane %v277_v18, 4 }
 0x13f   : > { %v280_v23 = vsel %vm265_vm10, %v278_v19, %v279_v20  ;;  %529 = vmatpush.bf16.msra.mxu0 %v671_v21  ;;  %543 = vmatpush.bf16.msra.mxu1 %v675_v22 }
 0x140   : > { %v282_v24 = vsel %vm281_vm12, %v275_v8, %v280_v23  ;;  %v662_v25 = vld [vmem:[#allocation2] sm:$0xf]  ;;  %v701_v27 = vld [vmem:[#allocation2 + $0x4] sm:$0xf] }
 0x141   : > { %284 = vst [vmem:[#allocation2 + $0x8] sm:$0xff] %v282_v24 }
 0x148   : > { %v702_v26 = vld [vmem:[#allocation2 + $0x4] sm:$0xf0]  ;;  %v664_v28 = vld [vmem:[#allocation2 + $0x8] sm:$0xf0] }
 0x149   : > { %v663_v17 = vor.u32 %v702_v26, %v662_v25  ;;  %v667_v29 = vor.u32 %v701_v27, %v664_v28 }
 0x14b   : > { %530 = vmatpush.bf16.msra.mxu0 %v663_v17  ;;  %544 = vmatpush.bf16.msra.mxu1 %v667_v29 }
 0x14e   : > { %692 = vmatmul.msk.bf16.vlgmr.msra.gmra.mxu0 %vm512_vm13, %v700_v30  ;;  %693 = vmatmul.msk.bf16.vlgmr.msra.gmra.mxu1 %vm512_vm13, %v700_v30 }
 0x1cb   : > { %v532_v31 = vpop.f32.mrf.mxu0  ;;  %v546_v32 = vpop.f32.mrf.mxu1 }
 0x1cc   : > { %v533_v37 = vadd.f32 %v532_v31, %v455_v33  ;;  %v547_v38 = vadd.f32 %v546_v32, %v455_v33 }
 0x1d3   : > { %v534_v35 = vpop.f32.mrf.mxu0  ;;  %v548_v36 = vpop.f32.mrf.mxu1 }
 0x1d4   : > { %v535_v39 = vadd.f32 %v534_v35, %v460_v34  ;;  %v549_v40 = vadd.f32 %v548_v36, %v460_v34 }
 0x1d6   : > { %v551_v41 = vmax.f32 %v533_v37, %v535_v39  ;;  %v552_v42 = vmax.f32 %v547_v38, %v549_v40 }
 0x1d8   : > { %553 = vst [vmem:[%s180_s9] sm:$0xff] %v551_v41 }
 0x1d9   : > { %554 = vst [vmem:[%s180_s9 + $0x8] sm:$0xff] %v552_v42 }
 0x1da   : > { %862 = shalt.err (!%p859_p8)
}
 0x1db   : > { %714 = dma.vmem_to_hbm [thread:$0]  (%p974_p5), %s570_s10, 256, %s572_s11, %s556_s16  }
 0x1dc PF: > { %p726_p9 = scmp.ge.s32.totalorder %s901_s15, 2  ;;  %s583_s28 = sand.u32 1, %s889_s12  }
 0x1dd   : > { %s584_s29 = scalar_lea.sflag [#allocation5], %s583_s28 }
 0x1de   : > { %p721_p10 = pnand %p726_p9, %p978_p6 }
 0x1e0   : > { %p722_p11 = pneg %p721_p10 }
 0x1e2   : > { %884 = dma.done.wait (%p722_p11), %s584_s29, 256  }
 0x1e3   : > { %886 = vsyncadd (%p722_p11), %s584_s29, 4294967040  ;;  %p14_p12 = scmp.ge.s32.totalorder %s961_s18, 4   ;;  %s1108_s12 = smov %s893_s13 }
 0x1e4   : > { %s1109_s13 = smov %s897_s14  ;;  %s1110_s14 = smov %s972_s21 }
 0x1e5   : > { %s1111_s15 = smov %s961_s18  ;;  %16 = sbr.rel (!%p14_p12) target bundleno = 4 (0x4), region = 72 }
 0x1ea   :  { %590 = vsyncpa [#allocation4], 1 }
 0x1eb   :  { %592 = vsyncpa [#allocation4 + $0x1], 1 }
 0x1ec   :  { %593 = vsyncpa [#allocation5], 1 }
 0x1ed   :  { %595 = vsyncpa [#allocation5 + $0x1], 1 }

</bundles_post_ra>
